<compile_context>
chip_gen: v7x
topology: tpu7x:2x2x1
jax: 0.10.0
libtpu: 0.0.40
codegen_flags: <defaults>
</compile_context>

<pallas_src>
import functools

import jax
import jax.numpy as jnp
from jax.experimental import pallas as pl
from jax.experimental.pallas import tpu as pltpu

LANES = 128
SUBLANES = 8
BLOCK_ELEMS = SUBLANES * LANES          # one f32 vreg = 1024 elements
MAX_TILE_GROUPS = 512                   # 512 * 4 KiB = 2 MiB per input per buffer


def _wdice_partial_kernel(o_ref, t_ref, acc_ref, *, groups, tile_groups, mask_tail):
    """Accumulates (3, 8, 128) vreg partial sums: [bce, o*dice_t, o+dice_t]."""
    k = pl.program_id(0)

    @pl.when(k == 0)
    def _():
        acc_ref[...] = jnp.zeros_like(acc_ref)

    o = o_ref[...].astype(jnp.float32)          # (tile_groups, 8, 128)
    t = t_ref[...].astype(jnp.float32)

    if mask_tail:
        # Only needed when the group axis does not divide evenly: the last grid
        # step's block reads out-of-bounds garbage.  Zero o/t BEFORE the logs so
        # masked elements contribute exactly 0 to every partial sum.
        g_idx = jax.lax.broadcasted_iota(jnp.int32, (tile_groups, 1, 1), 0)
        valid = (g_idx + k * tile_groups) < groups
        o = jnp.where(valid, o, 0.0)
        t = jnp.where(valid, t, 0.0)

    # dice_target = (targets == 1).float()  (hard 0/1 mask, as in the module)
    dice_t = (t == 1.0).astype(jnp.float32)

    # BCE elementwise term.  PyTorch's BCELoss clamps log() at -100; clamping
    # BEFORE the multiply means o=0 / o=1 (and masked zeros) never produce NaN.
    # Assumes post-sigmoid outputs in [0, 1] (PyTorch would raise otherwise).
    log_o = jnp.maximum(jnp.log(o), -100.0)
    log_1mo = jnp.maximum(jnp.log(1.0 - o), -100.0)
    bce = -(log_1mo + t * (log_o - log_1mo))    # == -(t*log_o + (1-t)*log_1mo)

    # Fold the tile vreg-wise down to (8, 128): plain VPU adds over the leading
    # group axis; no cross-lane (XLU) reduction in the hot loop.
    acc_ref[0] += jnp.sum(bce, axis=0)
    acc_ref[1] += jnp.sum(o * dice_t, axis=0)   # intersection
    acc_ref[2] += jnp.sum(o + dice_t, axis=0)   # union = sum(o) + sum(dice_t)


@functools.partial(jax.jit, static_argnames=("bce_weight", "dice_weight"))
def wdice_loss(outputs, targets, bce_weight=1.0, dice_weight=1.0):
    """Pallas implementation of WDiceLoss.forward(outputs, targets)."""
    total = outputs.size
    groups = pl.cdiv(total, BLOCK_ELEMS)
    padded_total = groups * BLOCK_ELEMS

    o_flat = outputs.reshape(-1)
    t_flat = targets.reshape(-1)
    if padded_total != total:
        # Only hit when total % 1024 != 0 (rare for NCHW tensors); pads <= 1023
        # zero elements, which contribute exactly 0 (clamp-before-multiply).
        # TODO(synk): avoid this copy with a 1D tail block if it shows up in profiles.
        o_flat = jnp.pad(o_flat, (0, padded_total - total))
        t_flat = jnp.pad(t_flat, (0, padded_total - total))

    # Free bitcast (contiguous row-major) in the common divisible case.
    o3 = o_flat.reshape(groups, SUBLANES, LANES)
    t3 = t_flat.reshape(groups, SUBLANES, LANES)

    tile_groups = min(MAX_TILE_GROUPS, groups)
    num_steps = pl.cdiv(groups, tile_groups)
    mask_tail = (groups % tile_groups) != 0

    kernel = functools.partial(
        _wdice_partial_kernel,
        groups=groups,
        tile_groups=tile_groups,
        mask_tail=mask_tail,
    )

    in_spec = pl.BlockSpec((tile_groups, SUBLANES, LANES), lambda k: (k, 0, 0))
    out_spec = pl.BlockSpec((3, SUBLANES, LANES), lambda k: (0, 0, 0))

    cost = pl.CostEstimate(
        flops=12 * padded_total,
        transcendentals=2 * padded_total,
        bytes_accessed=padded_total * (o3.dtype.itemsize + t3.dtype.itemsize)
        + 3 * BLOCK_ELEMS * 4,
    )

    partials = pl.pallas_call(
        kernel,
        out_shape=jax.ShapeDtypeStruct((3, SUBLANES, LANES), jnp.float32),
        grid_spec=pltpu.PrefetchScalarGridSpec(
            num_scalar_prefetch=0,
            grid=(num_steps,),
            in_specs=[in_spec, in_spec],
            out_specs=out_spec,
        ),
        compiler_params=pltpu.CompilerParams(
            # Single reduction axis with a resident output accumulator.
            dimension_semantics=("arbitrary",),
        ),
        cost_estimate=cost,
    )(o3, t3)

    # Epilogue: one cross-lane reduction of a tiny (3, 8, 128) slab.
    sums = partials.reshape(3, SUBLANES * LANES).sum(axis=1)
    bce_sum, inter_sum, union_sum = sums[0], sums[1], sums[2]

    eps = 1e-15
    bce_mean = bce_sum / float(total)            # mean over REAL elements only
    intersection = inter_sum + eps
    union = union_sum + eps
    loss = bce_mean * bce_weight
    loss = loss + (1.0 - jnp.log(2.0 * intersection / union)) * dice_weight
    return loss


def _reference_loss(outputs, targets, bce_weight=1.0, dice_weight=1.0):
    eps = 1e-15
    log_o = jnp.maximum(jnp.log(outputs), -100.0)
    log_1mo = jnp.maximum(jnp.log(1.0 - outputs), -100.0)
    bce = jnp.mean(-(targets * log_o + (1.0 - targets) * log_1mo))
    dice_t = (targets == 1.0).astype(jnp.float32)
    intersection = jnp.sum(outputs * dice_t) + eps
    union = jnp.sum(outputs) + jnp.sum(dice_t) + eps
    return bce * bce_weight + (1.0 - jnp.log(2.0 * intersection / union)) * dice_weight


if __name__ == "__main__":
    key = jax.random.PRNGKey(0)
    k1, k2 = jax.random.split(key)

    # NCHW inputs, as the PyTorch module would receive from a sigmoid head.
    shape = (2, 4, 16, 16)
    outputs = jax.nn.sigmoid(jax.random.normal(k1, shape, dtype=jnp.float32))
    targets = jax.random.bernoulli(k2, p=0.5, shape=shape).astype(jnp.float32)

    loss = wdice_loss(outputs, targets, bce_weight=1.0, dice_weight=1.0)
    loss = jax.block_until_ready(loss)

    ref = _reference_loss(outputs, targets)
    assert jnp.allclose(loss, ref, rtol=1e-4, atol=1e-5), (loss, ref)

    print("KERNEL_OK")
</pallas_src>

<mosaic_0001>
module attributes {stable_mosaic.version = 11 : i64} {
  func.func @_wdice_partial_kernel(%arg0: i32, %arg1: memref<2x8x128xf32, #tpu.memory_space<vmem>>, %arg2: memref<2x8x128xf32, #tpu.memory_space<vmem>>, %arg3: memref<3x8x128xf32, #tpu.memory_space<vmem>>) attributes {dimension_semantics = [#tpu.dimension_semantics<arbitrary>], iteration_bounds = array<i64: 1>, scalar_prefetch = 0 : i64, scratch_operands = 0 : i64, tpu.core_type = #tpu.core_type<tc>, window_params = [{transform_indices = @transform_0, window_bounds = array<i64: 2, 8, 128>}, {transform_indices = @transform_1, window_bounds = array<i64: 2, 8, 128>}, {pipeline_mode = #tpu.pipeline_mode<synchronous>, transform_indices = @transform_2, window_bounds = array<i64: 3, 8, 128>}]} {
    %c0_i32 = arith.constant 0 : i32
    %0 = arith.cmpi eq, %arg0, %c0_i32 : i32
    %1 = arith.extui %0 : i1 to i32
    %c0_i32_0 = arith.constant 0 : i32
    %2 = arith.cmpi ne, %1, %c0_i32_0 : i32
    scf.if %2 {
      %cst_29 = arith.constant 0.000000e+00 : f32
      %45 = vector.broadcast %cst_29 : f32 to vector<3x8x128xf32>
      %c0_30 = arith.constant 0 : index
      %c0_31 = arith.constant 0 : index
      %c0_32 = arith.constant 0 : index
      %46 = vector.load %arg3[%c0_30, %c0_31, %c0_32] : memref<3x8x128xf32, #tpu.memory_space<vmem>>, vector<3x8x128xf32>
      tpu.vector_store %arg3[%c0_30, %c0_31, %c0_32], %45 {strides = array<i32>} : memref<3x8x128xf32, #tpu.memory_space<vmem>>, vector<3x8x128xf32>,
    } else {
    }
    %c0 = arith.constant 0 : index
    %c0_1 = arith.constant 0 : index
    %c0_2 = arith.constant 0 : index
    %3 = vector.load %arg1[%c0, %c0_1, %c0_2] : memref<2x8x128xf32, #tpu.memory_space<vmem>>, vector<2x8x128xf32>
    %c0_3 = arith.constant 0 : index
    %c0_4 = arith.constant 0 : index
    %c0_5 = arith.constant 0 : index
    %4 = vector.load %arg2[%c0_3, %c0_4, %c0_5] : memref<2x8x128xf32, #tpu.memory_space<vmem>>, vector<2x8x128xf32>
    %cst = arith.constant 1.000000e+00 : f32
    %5 = vector.broadcast %cst : f32 to vector<2x8x128xf32>
    %6 = arith.cmpf oeq, %4, %5 : vector<2x8x128xf32>
    %7 = arith.extui %6 : vector<2x8x128xi1> to vector<2x8x128xi32>
    %8 = arith.sitofp %7 : vector<2x8x128xi32> to vector<2x8x128xf32>
    %9 = math.log %3 : vector<2x8x128xf32>
    %cst_6 = arith.constant -1.000000e+02 : f32
    %10 = vector.broadcast %cst_6 : f32 to vector<2x8x128xf32>
    %11 = arith.maximumf %9, %10 : vector<2x8x128xf32>
    %cst_7 = arith.constant 1.000000e+00 : f32
    %12 = vector.broadcast %cst_7 : f32 to vector<2x8x128xf32>
    %13 = arith.subf %12, %3 : vector<2x8x128xf32>
    %14 = math.log %13 : vector<2x8x128xf32>
    %cst_8 = arith.constant -1.000000e+02 : f32
    %15 = vector.broadcast %cst_8 : f32 to vector<2x8x128xf32>
    %16 = arith.maximumf %14, %15 : vector<2x8x128xf32>
    %17 = arith.subf %11, %16 : vector<2x8x128xf32>
    %18 = arith.mulf %4, %17 : vector<2x8x128xf32>
    %19 = arith.addf %16, %18 : vector<2x8x128xf32>
    %cst_9 = arith.constant 0.000000e+00 : f32
    %20 = vector.broadcast %cst_9 : f32 to vector<2x8x128xf32>
    %21 = arith.subf %20, %19 : vector<2x8x128xf32>
    %c0_10 = arith.constant 0 : index
    %c0_11 = arith.constant 0 : index
    %c0_12 = arith.constant 0 : index
    %22 = vector.load %arg3[%c0_10, %c0_11, %c0_12] : memref<3x8x128xf32, #tpu.memory_space<vmem>>, vector<1x8x128xf32>
    %23 = vector.shape_cast %22 : vector<1x8x128xf32> to vector<8x128xf32>
    %cst_13 = arith.constant dense<0.000000e+00> : vector<8x128xf32>
    %24 = vector.multi_reduction <add>, %21, %cst_13 [0] : vector<2x8x128xf32> to vector<8x128xf32>
    %25 = arith.addf %23, %24 : vector<8x128xf32>
    %c0_14 = arith.constant 0 : index
    %c0_15 = arith.constant 0 : index
    %c0_16 = arith.constant 0 : index
    %26 = vector.load %arg3[%c0_14, %c0_15, %c0_16] : memref<3x8x128xf32, #tpu.memory_space<vmem>>, vector<1x8x128xf32>
    %27 = vector.shape_cast %26 : vector<1x8x128xf32> to vector<8x128xf32>
    %28 = vector.shape_cast %25 : vector<8x128xf32> to vector<1x8x128xf32>
    tpu.vector_store %arg3[%c0_14, %c0_15, %c0_16], %28 {strides = array<i32>} : memref<3x8x128xf32, #tpu.memory_space<vmem>>, vector<1x8x128xf32>,
    %c1 = arith.constant 1 : index
    %c0_17 = arith.constant 0 : index
    %c0_18 = arith.constant 0 : index
    %29 = vector.load %arg3[%c1, %c0_17, %c0_18] : memref<3x8x128xf32, #tpu.memory_space<vmem>>, vector<1x8x128xf32>
    %30 = vector.shape_cast %29 : vector<1x8x128xf32> to vector<8x128xf32>
    %31 = arith.mulf %3, %8 : vector<2x8x128xf32>
    %cst_19 = arith.constant dense<0.000000e+00> : vector<8x128xf32>
    %32 = vector.multi_reduction <add>, %31, %cst_19 [0] : vector<2x8x128xf32> to vector<8x128xf32>
    %33 = arith.addf %30, %32 : vector<8x128xf32>
    %c1_20 = arith.constant 1 : index
    %c0_21 = arith.constant 0 : index
    %c0_22 = arith.constant 0 : index
    %34 = vector.load %arg3[%c1_20, %c0_21, %c0_22] : memref<3x8x128xf32, #tpu.memory_space<vmem>>, vector<1x8x128xf32>
    %35 = vector.shape_cast %34 : vector<1x8x128xf32> to vector<8x128xf32>
    %36 = vector.shape_cast %33 : vector<8x128xf32> to vector<1x8x128xf32>
    tpu.vector_store %arg3[%c1_20, %c0_21, %c0_22], %36 {strides = array<i32>} : memref<3x8x128xf32, #tpu.memory_space<vmem>>, vector<1x8x128xf32>,
    %c2 = arith.constant 2 : index
    %c0_23 = arith.constant 0 : index
    %c0_24 = arith.constant 0 : index
    %37 = vector.load %arg3[%c2, %c0_23, %c0_24] : memref<3x8x128xf32, #tpu.memory_space<vmem>>, vector<1x8x128xf32>
    %38 = vector.shape_cast %37 : vector<1x8x128xf32> to vector<8x128xf32>
    %39 = arith.addf %3, %8 : vector<2x8x128xf32>
    %cst_25 = arith.constant dense<0.000000e+00> : vector<8x128xf32>
    %40 = vector.multi_reduction <add>, %39, %cst_25 [0] : vector<2x8x128xf32> to vector<8x128xf32>
    %41 = arith.addf %38, %40 : vector<8x128xf32>
    %c2_26 = arith.constant 2 : index
    %c0_27 = arith.constant 0 : index
    %c0_28 = arith.constant 0 : index
    %42 = vector.load %arg3[%c2_26, %c0_27, %c0_28] : memref<3x8x128xf32, #tpu.memory_space<vmem>>, vector<1x8x128xf32>
    %43 = vector.shape_cast %42 : vector<1x8x128xf32> to vector<8x128xf32>
    %44 = vector.shape_cast %41 : vector<8x128xf32> to vector<1x8x128xf32>
    tpu.vector_store %arg3[%c2_26, %c0_27, %c0_28], %44 {strides = array<i32>} : memref<3x8x128xf32, #tpu.memory_space<vmem>>, vector<1x8x128xf32>,
    return
  }
  func.func @transform_0(%arg0: i32) -> (i32, i32, i32) {
    %c0_i32 = arith.constant 0 : i32
    %c0_i32_0 = arith.constant 0 : i32
    %c0_i32_1 = arith.constant 0 : i32
    return %arg0, %c0_i32, %c0_i32_0 : i32, i32, i32
  }
  func.func @transform_1(%arg0: i32) -> (i32, i32, i32) {
    %c0_i32 = arith.constant 0 : i32
    %c0_i32_0 = arith.constant 0 : i32
    %c0_i32_1 = arith.constant 0 : i32
    return %arg0, %c0_i32, %c0_i32_0 : i32, i32, i32
  }
  func.func @transform_2(%arg0: i32) -> (i32, i32, i32) {
    %c0_i32 = arith.constant 0 : i32
    %c0_i32_0 = arith.constant 0 : i32
    %c0_i32_1 = arith.constant 0 : i32
    %c0_i32_2 = arith.constant 0 : i32
    return %c0_i32, %c0_i32_0, %c0_i32_1 : i32, i32, i32
  }
}

</mosaic_0001>

<bundles_post_ra>
// kernel: wdice_loss.1
= control target key start
LH: loop header
LB: loop body
LE: loop exit
PB: predicated region body
PF: predicated region fallthrough
CT: control target
= control target key end

     0   :  { %v87_v6 = vmov 0.0   ;;  %s124_s0 = inlined_call_operand.vmem [shape: f32[2,8,128], index: 0, kind: input, shape index: {}]   ;;  %s125_s1 = inlined_call_operand.vmem [shape: f32[2,8,128], index: 1, kind: input, shape index: {}]   ;;  %s126_s2 = inlined_call_operand.vmem [shape: f32[3,8,128], index: 2, kind: output, shape index: {}]  }
   0x1   :  { %v18_v0 = vld [vmem:[%s124_s0] sm:$0xff]  ;;  %v19_v1 = vld [vmem:[%s124_s0 + $0x8] sm:$0xff] }
   0x2   :  { %v20_v2 = vld [vmem:[%s125_s1] sm:$0xff]  ;;  %v21_v3 = vld [vmem:[%s125_s1 + $0x8] sm:$0xff]  ;;  %79 = vlog2.f32 %v18_v0  ;;  %v34_v4 = vsub.f32 1.0, %v18_v0  ;;  %v35_v5 = vsub.f32 1.0, %v19_v1 }
   0x3   :  { %vm22_vm0 = vcmp.eq.f32.partialorder %v20_v2, 1.0  ;;  %81 = vlog2.f32 %v19_v1  ;;  %vm23_vm1 = vcmp.eq.f32.partialorder %v21_v3, 1.0 }
   0x4   :  { %v72_v7 = vsel %vm22_vm0, 1.0, %v87_v6  ;;  %83 = vlog2.f32 %v34_v4  ;;  %v73_v8 = vsel %vm23_vm1, 1.0, %v87_v6 }
   0x5   :  { %v56_v9 = vmul.f32 %v72_v7, %v18_v0  ;;  %v63_v10 = vadd.f32 %v72_v7, %v18_v0  ;;  %85 = vlog2.f32 %v35_v5  ;;  %v57_v11 = vmul.f32 %v73_v8, %v19_v1 }
   0x6   :  { %v64_v12 = vadd.f32 %v73_v8, %v19_v1 }
   0x7   :  { %v58_v13 = vadd.f32 %v57_v11, %v56_v9 }
   0x8   :  { %v65_v14 = vadd.f32 %v64_v12, %v63_v10 }
   0x9   :  { %75 = vst [vmem:[%s126_s2 + $0x8] sm:$0xff] %v58_v13 }
   0xa   :  { %77 = vst [vmem:[%s126_s2 + $0x10] sm:$0xff] %v65_v14 }
   0xc   :  { %v80_v15 = vpop.eup %79 }
   0xd   :  { %v82_v16 = vpop.eup %81  ;;  %v29_v17 = vmul.f32 0.6931472, %v80_v15 }
   0xe   :  { %v84_v18 = vpop.eup %83  ;;  %v31_v19 = vmul.f32 0.6931472, %v82_v16 }
   0xf   :  { %v86_v20 = vpop.eup %85  ;;  %v32_v21 = vmax.f32 %v29_v17, -100.0  ;;  %v37_v22 = vmul.f32 0.6931472, %v84_v18 }
  0x10   :  { %v33_v23 = vmax.f32 %v31_v19, -100.0  ;;  %v39_v24 = vmul.f32 0.6931472, %v86_v20 }
  0x11   :  { %v40_v25 = vmax.f32 %v37_v22, -100.0 }
  0x12   :  { %v41_v26 = vmax.f32 %v39_v24, -100.0 }
  0x13   :  { %v42_v27 = vsub.f32 %v32_v21, %v40_v25 }
  0x14   :  { %v43_v28 = vsub.f32 %v33_v23, %v41_v26 }
  0x15   :  { %v44_v29 = vmul.f32 %v42_v27, %v20_v2 }
  0x16   :  { %v45_v30 = vmul.f32 %v43_v28, %v21_v3 }
  0x17   :  { %v46_v31 = vadd.f32 %v44_v29, %v40_v25 }
  0x18   :  { %v47_v32 = vadd.f32 %v45_v30, %v41_v26 }
  0x19   :  { %v48_v33 = vsub.f32 0.0, %v46_v31 }
  0x1a   :  { %v49_v34 = vsub.f32 0.0, %v47_v32 }
  0x1c   :  { %v51_v35 = vadd.f32 %v49_v34, %v48_v33 }
  0x1e   :  { %53 = vst [vmem:[%s126_s2] sm:$0xff] %v51_v35 }

</bundles_post_ra>
